<compile_context>
chip_gen: v7x
topology: tpu7x:2x2x1
jax: 0.10.0
libtpu: 0.0.40
codegen_flags: <defaults>
</compile_context>

<pallas_src>
import functools

import jax
import jax.numpy as jnp
from jax.experimental import pallas as pl
from jax.experimental.pallas import tpu as pltpu


def _round_up(n: int, m: int) -> int:
    return ((n + m - 1) // m) * m


# ----------------------------------------------------------------------------
# Kernels
# ----------------------------------------------------------------------------
def _fusion_linear_kernel(x_ref, y_ref, wa_ref, wb_ref, b_ref, o_ref):
    """out = x @ Wa + y @ Wb + bias  (concat already folded into Wa / Wb)."""
    acc = jnp.dot(x_ref[...], wa_ref[...], preferred_element_type=jnp.float32)
    acc = acc + jnp.dot(y_ref[...], wb_ref[...], preferred_element_type=jnp.float32)
    acc = acc + b_ref[...].astype(jnp.float32)
    o_ref[...] = acc.astype(o_ref.dtype)


def _fusion_concat_kernel(x_ref, y_ref, o_ref, *, fuse, in_feat):
    """Feature fusion without the Linear: store each piece into its sub-slice."""
    F = in_feat
    x = x_ref[...]
    y = y_ref[...]
    if fuse == "x/y/-":
        o_ref[:, 0:F] = x
        o_ref[:, F:2 * F] = y
        o_ref[:, 2 * F:3 * F] = (x - y).astype(o_ref.dtype)
    elif fuse == "+/-":
        o_ref[:, 0:F] = (x + y).astype(o_ref.dtype)
        o_ref[:, F:2 * F] = (x - y).astype(o_ref.dtype)
    elif fuse == "x/y":
        o_ref[:, 0:F] = x
        o_ref[:, F:2 * F] = y
    else:
        raise NotImplementedError(fuse)


# ----------------------------------------------------------------------------
# Wrapper (mirrors Fusion.forward)
# ----------------------------------------------------------------------------
def fusion_forward(x, y, *, fuse, w_t=None, b=None, tile_rows=512):
    """
    x, y : (B, T, in_feat)
    fuse : 'x/y/-' | '+/-' | 'x/y'
    w_t  : optional (cat_dim, fuse_dim) — fusion Linear weight, pre-transposed
           (cat_dim = 3*in_feat for 'x/y/-', else 2*in_feat)
    b    : optional (fuse_dim,)        — fusion Linear bias
    """
    B, T, F = x.shape
    assert y.shape == (B, T, F)
    if fuse == "x/y/-":
        cat_dim = 3 * F
    elif fuse in ("+/-", "x/y"):
        cat_dim = 2 * F
    else:
        raise NotImplementedError(fuse)

    # Collapse (B, T) -> rows; pad rows to the row-tile size (multiple of 8).
    rows = B * T
    tr = tile_rows if rows >= tile_rows else _round_up(rows, 8)
    rows_p = _round_up(rows, tr)

    x2 = x.reshape(rows, F)
    y2 = y.reshape(rows, F)
    if rows_p != rows:
        pad = ((0, rows_p - rows), (0, 0))
        x2 = jnp.pad(x2, pad)
        y2 = jnp.pad(y2, pad)

    grid = (rows_p // tr,)
    params = pltpu.CompilerParams(dimension_semantics=("parallel",))

    if w_t is not None:
        fuse_dim = w_t.shape[1]
        assert w_t.shape[0] == cat_dim
        w32 = w_t.astype(jnp.float32)
        # Fold the feature concatenation into the weights (done once, host/XLA).
        if fuse == "x/y/-":
            wa = w32[:F] + w32[2 * F:]
            wb = w32[F:2 * F] - w32[2 * F:]
        elif fuse == "+/-":
            wa = w32[:F] + w32[F:]
            wb = w32[:F] - w32[F:]
        else:  # "x/y"
            wa = w32[:F]
            wb = w32[F:]
        wa = wa.astype(x.dtype)   # bf16 inputs -> bf16 weights (half the DMA)
        wb = wb.astype(x.dtype)
        b2d = b.reshape(1, fuse_dim).astype(jnp.float32)

        out = pl.pallas_call(
            _fusion_linear_kernel,
            out_shape=jax.ShapeDtypeStruct((rows_p, fuse_dim), x.dtype),
            grid=grid,
            in_specs=[
                pl.BlockSpec((tr, F), lambda i: (i, 0)),
                pl.BlockSpec((tr, F), lambda i: (i, 0)),
                pl.BlockSpec((F, fuse_dim), lambda i: (0, 0)),
                pl.BlockSpec((F, fuse_dim), lambda i: (0, 0)),
                pl.BlockSpec((1, fuse_dim), lambda i: (0, 0)),
            ],
            out_specs=pl.BlockSpec((tr, fuse_dim), lambda i: (i, 0)),
            compiler_params=params,
        )(x2, y2, wa, wb, b2d)
        out_dim = fuse_dim
    else:
        kernel = functools.partial(_fusion_concat_kernel, fuse=fuse, in_feat=F)
        out = pl.pallas_call(
            kernel,
            out_shape=jax.ShapeDtypeStruct((rows_p, cat_dim), x.dtype),
            grid=grid,
            in_specs=[
                pl.BlockSpec((tr, F), lambda i: (i, 0)),
                pl.BlockSpec((tr, F), lambda i: (i, 0)),
            ],
            out_specs=pl.BlockSpec((tr, cat_dim), lambda i: (i, 0)),
            compiler_params=params,
        )(x2, y2)
        out_dim = cat_dim

    if rows_p != rows:
        out = out[:rows]
    return out.reshape(B, T, out_dim)


# ----------------------------------------------------------------------------
# Pure-JAX reference (exact semantics of Fusion.forward)
# ----------------------------------------------------------------------------
def fusion_ref(x, y, *, fuse, w_t=None, b=None):
    xf = x.astype(jnp.float32)
    yf = y.astype(jnp.float32)
    if fuse == "x/y/-":
        f = jnp.concatenate([xf, yf, xf - yf], axis=2)
    elif fuse == "+/-":
        f = jnp.concatenate([xf + yf, xf - yf], axis=2)
    elif fuse == "x/y":
        f = jnp.concatenate([xf, yf], axis=2)
    else:
        raise NotImplementedError(fuse)
    if w_t is not None:
        f = jnp.einsum("btk,kn->btn", f, w_t.astype(jnp.float32)) + b
    return f


# ----------------------------------------------------------------------------
if __name__ == "__main__":
    key = jax.random.PRNGKey(0)
    k1, k2, k3, k4 = jax.random.split(key, 4)

    # Small shapes consistent with the module: (batch, seq, in_feat)
    B, T, in_feat = 2, 8, 32
    fuse = "x/y/-"            # cat_dim = 3 * in_feat
    fuse_dim = 32             # fusion Linear: 3*in_feat -> fuse_dim
    cat_dim = 3 * in_feat     # Linear fan_in

    x = jax.random.normal(k1, (B, T, in_feat), dtype=jnp.float32)
    y = jax.random.normal(k2, (B, T, in_feat), dtype=jnp.float32)

    # Deterministic nn.Linear-style init: U(-1/sqrt(fan_in), 1/sqrt(fan_in)).
    bound = 1.0 / (cat_dim ** 0.5)
    w = jax.random.uniform(k3, (fuse_dim, cat_dim), jnp.float32, -bound, bound)
    b = jax.random.uniform(k4, (fuse_dim,), jnp.float32, -bound, bound)
    w_t = w.T  # pre-transpose: (cat_dim, fuse_dim)

    # 1) fusion + Linear, f32
    out = jax.block_until_ready(fusion_forward(x, y, fuse=fuse, w_t=w_t, b=b))
    ref = fusion_ref(x, y, fuse=fuse, w_t=w_t, b=b)
    assert out.shape == (B, T, fuse_dim), out.shape
    assert jnp.allclose(out, ref, atol=1e-4, rtol=1e-4), "mismatch vs reference (x/y/- linear)"

    # 2) fusion only (no Linear), '+/-'
    out2 = jax.block_until_ready(fusion_forward(x, y, fuse="+/-"))
    ref2 = fusion_ref(x, y, fuse="+/-")
    assert out2.shape == (B, T, 2 * in_feat)
    assert jnp.allclose(out2, ref2, atol=1e-5, rtol=1e-5), "mismatch vs reference (+/- no-linear)"

    # 3) fusion + Linear with bf16 activations / weights (f32 accumulation)
    xb = x.astype(jnp.bfloat16)
    yb = y.astype(jnp.bfloat16)
    out3 = jax.block_until_ready(fusion_forward(xb, yb, fuse="+/-", w_t=w_t[: 2 * in_feat], b=b))
    ref3 = fusion_ref(xb, yb, fuse="+/-", w_t=w_t[: 2 * in_feat], b=b)
    assert out3.shape == (B, T, fuse_dim)
    assert jnp.allclose(out3.astype(jnp.float32), ref3, atol=1e-1, rtol=1e-1), \
        "mismatch vs reference (bf16 linear)"

    print("KERNEL_OK")
</pallas_src>

<mosaic_0001>
module attributes {stable_mosaic.version = 11 : i64} {
  func.func @_fusion_linear_kernel(%arg0: i32, %arg1: memref<16x32xf32, #tpu.memory_space<vmem>>, %arg2: memref<16x32xf32, #tpu.memory_space<vmem>>, %arg3: memref<32x32xf32, #tpu.memory_space<vmem>>, %arg4: memref<32x32xf32, #tpu.memory_space<vmem>>, %arg5: memref<1x32xf32, #tpu.memory_space<vmem>>, %arg6: memref<16x32xf32, #tpu.memory_space<vmem>>) attributes {dimension_semantics = [#tpu.dimension_semantics<parallel>], iteration_bounds = array<i64: 1>, scalar_prefetch = 0 : i64, scratch_operands = 0 : i64, tpu.core_type = #tpu.core_type<tc>, window_params = [{transform_indices = @transform_0, window_bounds = array<i64: 16, 32>}, {transform_indices = @transform_1, window_bounds = array<i64: 16, 32>}, {pipeline_mode = #tpu.pipeline_mode<synchronous>, transform_indices = @transform_2, window_bounds = array<i64: 32, 32>}, {pipeline_mode = #tpu.pipeline_mode<synchronous>, transform_indices = @transform_3, window_bounds = array<i64: 32, 32>}, {pipeline_mode = #tpu.pipeline_mode<synchronous>, transform_indices = @transform_4, window_bounds = array<i64: 1, 32>}, {transform_indices = @transform_5, window_bounds = array<i64: 16, 32>}]} {
    %c0 = arith.constant 0 : index
    %c0_0 = arith.constant 0 : index
    %0 = vector.load %arg1[%c0, %c0_0] : memref<16x32xf32, #tpu.memory_space<vmem>>, vector<16x32xf32>
    %c0_1 = arith.constant 0 : index
    %c0_2 = arith.constant 0 : index
    %1 = vector.load %arg3[%c0_1, %c0_2] : memref<32x32xf32, #tpu.memory_space<vmem>>, vector<32x32xf32>
    %cst = arith.constant dense<0.000000e+00> : vector<16x32xf32>
    %2 = tpu.matmul %0, %1, %cst {dimension_numbers = #tpu.dot_dimension_numbers<[1], [0], [0], [1], [0, 0, 1, 1], [], []>} : vector<16x32xf32>, vector<32x32xf32>, vector<16x32xf32> -> vector<16x32xf32>
    %c0_3 = arith.constant 0 : index
    %c0_4 = arith.constant 0 : index
    %3 = vector.load %arg2[%c0_3, %c0_4] : memref<16x32xf32, #tpu.memory_space<vmem>>, vector<16x32xf32>
    %c0_5 = arith.constant 0 : index
    %c0_6 = arith.constant 0 : index
    %4 = vector.load %arg4[%c0_5, %c0_6] : memref<32x32xf32, #tpu.memory_space<vmem>>, vector<32x32xf32>
    %cst_7 = arith.constant dense<0.000000e+00> : vector<16x32xf32>
    %5 = tpu.matmul %3, %4, %cst_7 {dimension_numbers = #tpu.dot_dimension_numbers<[1], [0], [0], [1], [0, 0, 1, 1], [], []>} : vector<16x32xf32>, vector<32x32xf32>, vector<16x32xf32> -> vector<16x32xf32>
    %6 = arith.addf %2, %5 : vector<16x32xf32>
    %c0_8 = arith.constant 0 : index
    %c0_9 = arith.constant 0 : index
    %7 = vector.load %arg5[%c0_8, %c0_9] : memref<1x32xf32, #tpu.memory_space<vmem>>, vector<1x32xf32>
    %8 = vector.broadcast %7 : vector<1x32xf32> to vector<16x32xf32>
    %9 = arith.addf %6, %8 : vector<16x32xf32>
    %c0_10 = arith.constant 0 : index
    %c0_11 = arith.constant 0 : index
    %10 = vector.load %arg6[%c0_10, %c0_11] : memref<16x32xf32, #tpu.memory_space<vmem>>, vector<16x32xf32>
    tpu.vector_store %arg6[%c0_10, %c0_11], %9 {strides = array<i32>} : memref<16x32xf32, #tpu.memory_space<vmem>>, vector<16x32xf32>,
    return
  }
  func.func @transform_0(%arg0: i32) -> (i32, i32) {
    %c0_i32 = arith.constant 0 : i32
    %c0_i32_0 = arith.constant 0 : i32
    return %arg0, %c0_i32 : i32, i32
  }
  func.func @transform_1(%arg0: i32) -> (i32, i32) {
    %c0_i32 = arith.constant 0 : i32
    %c0_i32_0 = arith.constant 0 : i32
    return %arg0, %c0_i32 : i32, i32
  }
  func.func @transform_2(%arg0: i32) -> (i32, i32) {
    %c0_i32 = arith.constant 0 : i32
    %c0_i32_0 = arith.constant 0 : i32
    %c0_i32_1 = arith.constant 0 : i32
    return %c0_i32, %c0_i32_0 : i32, i32
  }
  func.func @transform_3(%arg0: i32) -> (i32, i32) {
    %c0_i32 = arith.constant 0 : i32
    %c0_i32_0 = arith.constant 0 : i32
    %c0_i32_1 = arith.constant 0 : i32
    return %c0_i32, %c0_i32_0 : i32, i32
  }
  func.func @transform_4(%arg0: i32) -> (i32, i32) {
    %c0_i32 = arith.constant 0 : i32
    %c0_i32_0 = arith.constant 0 : i32
    %c0_i32_1 = arith.constant 0 : i32
    return %c0_i32, %c0_i32_0 : i32, i32
  }
  func.func @transform_5(%arg0: i32) -> (i32, i32) {
    %c0_i32 = arith.constant 0 : i32
    %c0_i32_0 = arith.constant 0 : i32
    return %arg0, %c0_i32 : i32, i32
  }
}

</mosaic_0001>

<bundles_post_ra>
// kernel: tpu_custom_call.1
= control target key start
LH: loop header
LB: loop body
LE: loop exit
PB: predicated region body
PF: predicated region fallthrough
CT: control target
= control target key end

     0   :  { %10 = vsyncpa [#allocation3], 0  ;;  %s598_s0 = inlined_call_operand.hbm [shape: f32[16,32], index: 0, kind: input, shape index: {}]   ;;  %s599_s1 = inlined_call_operand.hbm [shape: f32[16,32], index: 1, kind: input, shape index: {}]   ;;  %s600_s2 = inlined_call_operand.hbm [shape: f32[32,32], index: 2, kind: input, shape index: {}]   ;;  %s601_s3 = inlined_call_operand.hbm [shape: f32[32,32], index: 3, kind: input, shape index: {}]   ;;  %s602_s4 = inlined_call_operand.vmem [shape: f32[1,32], index: 4, kind: input, shape index: {}]   ;;  %s603_s5 = inlined_call_operand.hbm [shape: f32[16,32], index: 5, kind: output, shape index: {}]  }
   0x1   :  { %11 = vsyncpa [#allocation6], 0 }
   0x2   :  { %12 = vsyncpa [#allocation9], 0 }
   0x3   :  { %13 = vsyncpa [#allocation4], 0  ;;  %s463_s18 = smov [#allocation5]   ;;  %s464_s20 = smov [#allocation2]  }
   0x4   :  { %s31_s19 = sshll.u32 %s463_s18, 4  ;;  %s19_s21 = sshll.u32 %s464_s20, 4  ;;  %s32_s19 = int_to_ptr.vmem [resolvable:$true] %s31_s19  ;;  %s500_s21 = int_to_ptr.vmem [resolvable:$true] %s19_s21 }
   0x5   :  { %s345_s24 = scalar_lea.hbm %s599_s1, 256 }
   0x6   :  { %p346_p0 = scmp.ne.s32.totalorder %s599_s1, %s345_s24  ;;  %p349_p1 = scmp.lt.u32.totalorder %s345_s24, %s599_s1 }
   0x8   :  { %p351_p2 = pnand %p349_p1, %p346_p0 }
   0xa   :  { %354 = shalt.err (!%p351_p2)
}
   0xb   :  { %s355_s29 = scalar_lea.vmem %s32_s19, 256  ;;  %p360_p4 = scmp.lt.s32.totalorder %s32_s19, %s32_s19 }
   0xc   :  { %p356_p3 = scmp.ne.s32.totalorder %s32_s19, %s355_s29  ;;  %p361_p5 = scmp.lt.s32.totalorder %s355_s29, %s355_s29 }
   0xe   :  { %p362_p6 = por %p361_p5, %p360_p4 }
  0x10   :  { %p363_p7 = pnand %p362_p6, %p356_p3 }
  0x12   :  { %366 = shalt.err (!%p363_p7)
}
  0x13   :  { %s465_s30 = smov 128   ;;  %s466_s6 = smov 8  }
  0x14   :  { %37 = dma.hbm_to_vmem [thread:$0]  %s599_s1, 256, %s32_s19, [#allocation6], %s465_s30, %s465_s30, %s466_s6  }
  0x15   :  { %s367_s11 = scalar_lea.hbm %s598_s0, 256 }
  0x16   :  { %p368_p8 = scmp.ne.s32.totalorder %s598_s0, %s367_s11  ;;  %p371_p9 = scmp.lt.u32.totalorder %s367_s11, %s598_s0 }
  0x18   :  { %p373_p10 = pnand %p371_p9, %p368_p8 }
  0x1a   :  { %376 = shalt.err (!%p373_p10)
}
  0x1b   :  { %s377_s16 = scalar_lea.vmem %s500_s21, 256  ;;  %p382_p12 = scmp.lt.s32.totalorder %s500_s21, %s500_s21 }
  0x1c   :  { %p378_p11 = scmp.ne.s32.totalorder %s500_s21, %s377_s16  ;;  %p383_p13 = scmp.lt.s32.totalorder %s377_s16, %s377_s16 }
  0x1e   :  { %p384_p0 = por %p383_p13, %p382_p12 }
  0x20   :  { %p385_p1 = pnand %p384_p0, %p378_p11 }
  0x22   :  { %388 = shalt.err (!%p385_p1)
}
  0x23   :  { %25 = dma.hbm_to_vmem [thread:$0]  %s598_s0, 256, %s500_s21, [#allocation3], %s465_s30, %s465_s30, %s466_s6  }
  0x24   :  { %s467_s18 = smov [#allocation7]   ;;  %s468_s20 = smov [#allocation8]  }
  0x25   :  { %s43_s19 = sshll.u32 %s467_s18, 4  ;;  %s55_s22 = sshll.u32 %s468_s20, 4  ;;  %s44_s19 = int_to_ptr.vmem [resolvable:$true] %s43_s19  ;;  %s537_s22 = int_to_ptr.vmem [resolvable:$true] %s55_s22 }
  0x26   :  { %s389_s25 = scalar_lea.hbm %s600_s2, 512 }
  0x27   :  { %p390_p2 = scmp.ne.s32.totalorder %s600_s2, %s389_s25  ;;  %p393_p3 = scmp.lt.u32.totalorder %s389_s25, %s600_s2 }
  0x29   :  { %p395_p4 = pnand %p393_p3, %p390_p2 }
  0x2b   :  { %398 = shalt.err (!%p395_p4)
}
  0x2c   :  { %s399_s0 = scalar_lea.vmem %s44_s19, 512  ;;  %p404_p6 = scmp.lt.s32.totalorder %s44_s19, %s44_s19 }
  0x2d   :  { %p400_p5 = scmp.ne.s32.totalorder %s44_s19, %s399_s0  ;;  %p405_p7 = scmp.lt.s32.totalorder %s399_s0, %s399_s0 }
  0x2f   :  { %p406_p8 = por %p405_p7, %p404_p6 }
  0x31   :  { %p407_p9 = pnand %p406_p8, %p400_p5 }
  0x33   :  { %410 = shalt.err (!%p407_p9)
}
  0x34   :  { %49 = dma.hbm_to_vmem [thread:$0]  %s600_s2, 512, %s44_s19, [#allocation6], %s465_s30, %s465_s30, %s466_s6  }
  0x35   :  { %s411_s10 = scalar_lea.hbm %s601_s3, 512 }
  0x36   :  { %p412_p10 = scmp.ne.s32.totalorder %s601_s3, %s411_s10  ;;  %p415_p11 = scmp.lt.u32.totalorder %s411_s10, %s601_s3 }
  0x38   :  { %p417_p12 = pnand %p415_p11, %p412_p10 }
  0x3a   :  { %420 = shalt.err (!%p417_p12)
}
  0x3b   :  { %s421_s15 = scalar_lea.vmem %s537_s22, 512  ;;  %p426_p0 = scmp.lt.s32.totalorder %s537_s22, %s537_s22 }
  0x3c   :  { %p422_p13 = scmp.ne.s32.totalorder %s537_s22, %s421_s15  ;;  %p427_p1 = scmp.lt.s32.totalorder %s421_s15, %s421_s15 }
  0x3e   :  { %p428_p2 = por %p427_p1, %p426_p0 }
  0x40   :  { %p429_p3 = pnand %p428_p2, %p422_p13 }
  0x42   :  { %432 = shalt.err (!%p429_p3)
}
  0x43   :  { %61 = dma.hbm_to_vmem [thread:$0]  %s601_s3, 512, %s537_s22, [#allocation9], %s465_s30, %s465_s30, %s466_s6  }
  0x44   :  { %455 = dma.done.wait [#allocation3], 256  }
  0x45   :  { %456 = vsyncadd [#allocation3], 4294967040 }
  0x46   :  { %457 = dma.done.wait [#allocation6], 768  }
  0x47   :  { %458 = vsyncadd [#allocation6], 4294966528 }
  0x48   :  { %459 = dma.done.wait [#allocation9], 512  }
  0x49   :  { %460 = vsyncadd [#allocation9], 4294966784  ;;  %v84_v0 = vld [vmem:[#allocation8] sm:$0xff]  ;;  %v85_v1 = vld [vmem:[#allocation8 + $0x8] sm:$0xff]  ;;  %vm88_vm0 = vcmask 261120   ;;  %s469_s17 = smov [#allocation10]  }
  0x4a   :  { %v78_v2 = vld [vmem:[#allocation7] sm:$0xff]  ;;  %v320_v3 = vpack.c.bf16 %v85_v1, %v84_v0  ;;  %v79_v4 = vld [vmem:[#allocation7 + $0x8] sm:$0xff]  ;;  %v86_v5 = vld [vmem:[#allocation8 + $0x10] sm:$0xff]  ;;  %s267_s18 = sshll.u32 %s469_s17, 4  ;;  %s268_s18 = int_to_ptr.vmem [resolvable:$true] %s267_s18 }
  0x4b   :  { %v87_v6 = vld [vmem:[#allocation8 + $0x18] sm:$0xff]  ;;  %v328_v7 = vpack.c.bf16 %v79_v4, %v78_v2  ;;  %v80_v9 = vld [vmem:[#allocation7 + $0x10] sm:$0xff]  ;;  %v76_v13 = vld [vmem:[#allocation2] sm:$0xff]  ;;  %s433_s19 = scalar_lea.vmem %s268_s18, 256  ;;  %p438_p5 = scmp.lt.s32.totalorder %s268_s18, %s268_s18 }
  0x4c   :  { %v324_v8 = vpack.c.bf16 %v87_v6, %v86_v5  ;;  %v81_v10 = vld [vmem:[#allocation7 + $0x18] sm:$0xff]  ;;  %v82_v11 = vld [vmem:[#allocation5] sm:$0xff]  ;;  %321 = vmatprep.subr.bf16.mxu1 %v320_v3  ;;  %317 = vmatprep.mubr.msk.f32.mxu0 %vm88_vm0, %v76_v13  ;;  %v77_v15 = vld [vmem:[#allocation2 + $0x8] sm:$0xff]  ;;  %p434_p4 = scmp.ne.s32.totalorder %s268_s18, %s433_s19  ;;  %p439_p6 = scmp.lt.s32.totalorder %s433_s19, %s433_s19 }
  0x4d   :  { %v332_v12 = vpack.c.bf16 %v81_v10, %v80_v9  ;;  %306 = vmatprep.mubr.msk.f32.mxu1 %vm88_vm0, %v82_v11  ;;  %329 = vmatprep.subr.bf16.mxu0 %v328_v7  ;;  %v83_v14 = vld [vmem:[#allocation5 + $0x8] sm:$0xff]  ;;  %v285_v18 = vld [vmem:[%s602_s4] ss:$0 sm:$0xff] }
  0x4e   :  { %323 = vmatpush3.bf16.msra.mxu1 %v320_v3  ;;  %331 = vmatpush3.bf16.msra.mxu0 %v328_v7  ;;  %p440_p7 = por %p439_p6, %p438_p5 }
  0x4f   :  { %325 = vmatprep.subr.bf16.mxu1 %v324_v8  ;;  %333 = vmatprep.subr.bf16.mxu0 %v332_v12 }
  0x50   :  { %p441_p8 = pnand %p440_p7, %p434_p4 }
  0x52   :  { %327 = vmatpush3.bf16.msra.mxu1 %v324_v8  ;;  %335 = vmatpush3.bf16.msra.mxu0 %v332_v12 }
  0x55   :  { %307 = vmatmul.mubr.msk.f32.vlgmr.msra.gmra.mrb[0].mxu1 %vm88_vm0, %v83_v14  ;;  %318 = vmatmul.mubr.msk.f32.vlgmr.msra.gmra.mrb[0].mxu0 %vm88_vm0, %v77_v15 }
 0x128   :  { %v308_v16 = vpop.f32.mrb[0].mxu1  ;;  %v319_v17 = vpop.f32.mrb[0].mxu0 }
 0x129   :  { %v161_v19 = vpop.f32.mrb[1].mxu1  ;;  %v248_v20 = vadd.f32 %v319_v17, %v308_v16  ;;  %v242_v21 = vpop.f32.mrb[1].mxu0 }
 0x12a   :  { %v243_v22 = vadd.f32 %v242_v21, %v161_v19 }
 0x12b   :  { %v259_v23 = vadd.f32 %v285_v18, %v248_v20 }
 0x12c   :  { %v258_v24 = vadd.f32 %v285_v18, %v243_v22 }
 0x12d   :  { %261 = vst.msk [vmem:[#allocation10 + $0x8] sm:$0xff] %vm88_vm0, %v259_v23 }
 0x12e   :  { %260 = vst.msk [vmem:[#allocation10] sm:$0xff] %vm88_vm0, %v258_v24 }
 0x12f   :  { %444 = shalt.err (!%p441_p8)
}
 0x130   :  { %s445_s22 = scalar_lea.hbm %s603_s5, 256 }
 0x131   :  { %p446_p9 = scmp.ne.s32.totalorder %s603_s5, %s445_s22  ;;  %p449_p10 = scmp.lt.u32.totalorder %s445_s22, %s603_s5 }
 0x133   :  { %p451_p11 = pnand %p449_p10, %p446_p9 }
 0x135   :  { %454 = shalt.err (!%p451_p11)
}
 0x136   :  { %273 = dma.vmem_to_hbm [thread:$0]  %s268_s18, 256, %s603_s5, [#allocation4], %s465_s30, %s465_s30, %s466_s6  }
 0x137   :  { %461 = dma.done.wait [#allocation4], 256  }
 0x138   :  { %462 = vsyncadd [#allocation4], 4294967040 }
 0x139   :  { %277 = vsyncpa [#allocation3], 1 }
 0x13a   :  { %278 = vsyncpa [#allocation6], 1 }
 0x13b   :  { %279 = vsyncpa [#allocation9], 1 }
 0x13c   :  { %280 = vsyncpa [#allocation4], 1 }

</bundles_post_ra>
